<compile_context>
chip_gen: v7x
topology: tpu7x:2x2x1
jax: 0.10.0
libtpu: 0.0.40
codegen_flags: <defaults>
</compile_context>

<pallas_src>
import functools
import math

import jax
import jax.numpy as jnp
import numpy as np
from jax.experimental import pallas as pl
from jax.experimental.pallas import tpu as pltpu


def _out_len(T, k, stride, padding, dilation, ceil_mode):
    """PyTorch MaxPool1d/AvgPool1d output-length formula (incl. ceil_mode rule)."""
    eff_k = dilation * (k - 1) + 1
    num = T + 2 * padding - eff_k
    if ceil_mode:
        L = -(-num // stride) + 1
        # PyTorch: the last window must start inside the input or left padding.
        if (L - 1) * stride >= T + padding:
            L -= 1
    else:
        L = num // stride + 1
    return max(int(L), 0)


def _pool1d_kernel(x_ref, o_ref, *, pool_type, k, stride, dilation, l_blk,
                   inv_div, padded_valid):
    """x_ref block: (Bb, T_blk, Cb); o_ref block: (Bb, l_blk, Cb).

    Vectorized over the whole block: window element d of every output row is one
    strided slab read, so traced code is O(k), not O(Bb*k).
    (Strided pl.ds reads lower to native sublane-strided loads on Mosaic.)
    """
    def slab(d):
        start = d * dilation
        if stride == 1:
            idx = pl.ds(start, l_blk)
        else:
            idx = pl.ds(start, l_blk, stride=stride)   # strided sublane read
        return x_ref[:, idx, :]                        # (Bb, l_blk, Cb)

    if pool_type == "max":
        acc = slab(0)                                  # stay in native dtype
        for d in range(1, k):
            acc = jnp.maximum(acc, slab(d))
        o_ref[...] = acc
    else:  # avg: accumulate in f32
        acc = slab(0).astype(jnp.float32)
        for d in range(1, k):
            acc = acc + slab(d).astype(jnp.float32)
        if inv_div is not None:                        # uniform divisor (common case)
            acc = acc * jnp.float32(inv_div)
        else:                                          # ceil-mode ragged last window
            j = jax.lax.broadcasted_iota(jnp.int32, acc.shape, 1)
            j = (pl.program_id(1) * l_blk + j).astype(jnp.float32)
            div = jnp.minimum(
                jnp.float32(k),
                jnp.maximum(jnp.float32(1.0),
                            jnp.float32(padded_valid) - j * jnp.float32(stride)))
            acc = acc / div
        o_ref[...] = acc.astype(o_ref.dtype)


def _vmem_capacity_bytes():
    """Generation-aware VMEM capacity (128 MiB v5e/v6e, 64 MiB v7x)."""
    try:
        cap = int(pltpu.get_tpu_info().vmem_capacity_bytes)
        if cap > 0:
            return cap
    except Exception:
        pass
    return 128 * 1024 * 1024


def _largest_divisor_leq(n, cap, max_scan=256):
    cap = max(1, min(int(cap), int(n)))
    for d in range(cap, max(0, cap - max_scan), -1):
        if n % d == 0:
            return d
    return None


def pooling1d(x, pool_type="max", kernel_size=3, pool_axis=1,
              ceil_mode=False, padding=0, dilation=1, stride=None):
    """JAX/Pallas equivalent of Pooling1d(pool_type, kernel_size, ...).forward(x)."""
    if pool_type not in ("max", "avg"):
        raise ValueError("pool_type must be 'avg' or 'max'")
    k = int(kernel_size)
    stride = k if stride is None else int(stride)
    padding = int(padding)
    dilation = 1 if pool_type == "avg" else int(dilation)   # AvgPool has no dilation

    # ---- layout glue: pooled axis -> sublanes (-2), last axis -> lanes, rest -> batch
    x_m = jnp.moveaxis(x, pool_axis, -2)
    lead = x_m.shape[:-2]
    T, C = int(x_m.shape[-2]), int(x_m.shape[-1])
    B = int(math.prod(lead)) if lead else 1
    x3 = x_m.reshape(B, T, C)

    L_out = _out_len(T, k, stride, padding, dilation, ceil_mode)
    if L_out == 0:
        out3 = jnp.zeros((B, 0, C), x.dtype)
        return jnp.moveaxis(out3.reshape(lead + (0, C)), -2, pool_axis)

    if pool_type == "max":
        # NOTE: PyTorch rejects padding > kernel_size/2, so a window is never fully
        # inside padding and the -inf / INT_MIN fill never leaks into the output.
        pad_val = (-float("inf") if jnp.issubdtype(x.dtype, jnp.floating)
                   else int(jnp.iinfo(x.dtype).min))
    else:
        pad_val = 0

    itemsize = jnp.dtype(x.dtype).itemsize
    needed = (L_out - 1) * stride + (k - 1) * dilation + 1   # padded rows actually read
    padded_valid = T + 2 * padding                           # PyTorch avg divisor bound

    if pool_type == "avg":
        # Divisor is min(k, T + 2p - j*stride); only the last window can be ragged
        # (ceil_mode).  count_include_pad=True semantics (PyTorch default).
        div_last = min(k, padded_valid - (L_out - 1) * stride)
        inv_div = (1.0 / float(k)) if div_last >= k else None
    else:
        inv_div = None

    # ---- generation-aware VMEM budget for the double-buffered (in + out) block
    cap = _vmem_capacity_bytes()
    budget = max(4 << 20, min(cap // 4, 40 << 20))   # ~32 MiB v5e/v6e, ~16 MiB v7x

    def fits(cb, t_blk, l_blk):
        return 2 * (t_blk + l_blk) * cb * itemsize <= budget

    # Default: one block spans the full pooled axis and all channels (block dim ==
    # full array dim is legal, so no lane padding / output slicing for small C).
    Cb, C_pad = C, C
    Lt, L_out_pad, nt = L_out, L_out, 1
    T_blk = T + padding + max(0, needed - T - padding)       # padded time length

    if not fits(Cb, T_blk, Lt):
        # 1) tile channels in lane-aligned blocks (no padding) when C is 128-aligned
        if C % 128 == 0 and C > 128:
            Cb = 128
            for m in range(C // 128, 0, -1):
                cb = m * 128
                if C % cb == 0 and fits(cb, T_blk, Lt):
                    Cb = cb
                    break
        # 2) tile the pooled axis: exact for the default non-overlapping stride == k case
        if not fits(Cb, T_blk, Lt) and stride == k and dilation == 1 and L_out > 8:
            per_row = 2 * (k + 1) * Cb * itemsize            # k in rows + 1 out row, x2 buffers
            lt = max(8, (budget // per_row) // 8 * 8)
            if lt < L_out:
                Lt = lt
                L_out_pad = -(-L_out // Lt) * Lt
                nt = L_out_pad // Lt
                T_blk = Lt * k
        # 3) last resort for huge, non-128-aligned channel counts: pad + tile lanes
        if not fits(Cb, T_blk, Lt) and C % 128 != 0 and C > 128:
            C_pad = -(-C // 128) * 128
            Cb = 128
            for m in range(C_pad // 128, 0, -1):
                cb = m * 128
                if C_pad % cb == 0 and fits(cb, T_blk, Lt):
                    Cb = cb
                    break
        # TODO(synk): overlapping-window (stride != kernel_size) time tiling for
        # extremely long pooled axes; below we only raise vmem_limit_bytes.

    nc = C_pad // Cb

    # ---- batch block: largest Bb within budget, keep >=~8 grid steps once blocks
    #      reach ~MiB scale, prefer a divisor of B so no batch padding is needed.
    row_bytes = (T_blk + Lt) * Cb * itemsize
    bb = max(1, min(B, budget // (2 * row_bytes)))
    other_steps = nt * nc
    if bb > 1 and (-(-B // bb)) * other_steps < 8 and bb * row_bytes > (1 << 20):
        want_b_steps = max(1, -(-8 // other_steps))
        bb_for_steps = max(1, -(-B // want_b_steps))
        bb_min_size = max(1, (1 << 20) // row_bytes)         # keep blocks >= ~1 MiB
        bb = max(min(bb, bb_for_steps), min(bb, bb_min_size))
    div_b = _largest_divisor_leq(B, bb)
    if div_b is not None and 2 * div_b >= bb:
        bb = div_b
    B_pad = -(-B // bb) * bb
    nb = B_pad // bb

    # ---- build the (possibly) padded input; skip the pad entirely when not needed
    if nt == 1:
        T_final = T_blk
        keep_T = T
    else:
        T_final = L_out_pad * k                  # stride == k, dilation == 1 here
        keep_T = min(T, T_final - padding)       # floor-mode leftovers are never read
    x_in = x3 if keep_T == T else x3[:, :keep_T, :]
    pad_widths = ((0, B_pad - B), (padding, T_final - padding - keep_T), (0, C_pad - C))
    if any(lo > 0 or hi > 0 for lo, hi in pad_widths):
        x_in = jnp.pad(x_in, pad_widths, constant_values=pad_val)

    kernel = functools.partial(
        _pool1d_kernel, pool_type=pool_type, k=k, stride=stride,
        dilation=dilation, l_blk=Lt, inv_div=inv_div, padded_valid=padded_valid)

    cp = {"dimension_semantics": ("parallel", "parallel", "parallel")}
    footprint = 2 * bb * row_bytes               # double-buffered in + out blocks
    if footprint > 12 * 1024 * 1024:
        cp["vmem_limit_bytes"] = int(min(cap - (8 << 20),
                                         max(footprint + (8 << 20), 32 << 20)))

    out3 = pl.pallas_call(
        kernel,
        out_shape=jax.ShapeDtypeStruct((B_pad, L_out_pad, C_pad), x.dtype),
        grid=(nb, nt, nc),
        in_specs=[pl.BlockSpec((bb, T_blk, Cb), lambda b, t, c: (b, t, c))],
        out_specs=pl.BlockSpec((bb, Lt, Cb), lambda b, t, c: (b, t, c)),
        compiler_params=pltpu.CompilerParams(**cp),
    )(x_in)

    if B_pad > B or L_out_pad > L_out or C_pad > C:
        out3 = out3[:B, :L_out, :C]
    out_m = out3.reshape(lead + (L_out, C))
    return jnp.moveaxis(out_m, -2, pool_axis)


def _ref_pool(xn, pool_type, k, stride=None, padding=0, dilation=1,
              ceil_mode=False, pool_axis=1):
    """Pure-numpy reference with PyTorch MaxPool1d/AvgPool1d semantics (rank-generic)."""
    stride = k if stride is None else stride
    if pool_type == "avg":
        dilation = 1
    xr = np.moveaxis(np.asarray(xn, np.float64), pool_axis, -1)
    T = xr.shape[-1]
    L = _out_len(T, k, stride, padding, dilation, ceil_mode)
    outs = []
    for j in range(L):
        start = j * stride - padding
        ts = [start + d * dilation for d in range(k)]
        valid = [t for t in ts if 0 <= t < T]
        win = np.stack([xr[..., t] for t in valid], axis=-1)
        if pool_type == "max":
            outs.append(win.max(-1))
        else:
            div = min(k, T + 2 * padding - j * stride)
            outs.append(win.sum(-1) / div)
    out = np.stack(outs, axis=-1)
    return np.moveaxis(out, -1, pool_axis)


if __name__ == "__main__":
    key = jax.random.PRNGKey(0)
    k_x, k_x4 = jax.random.split(key)

    # SpeechBrain docstring example: (batch, time, channels) = (10, 12, 40),
    # Pooling1d('max', 3) pools over time -> (10, 4, 40).
    x = jax.random.uniform(k_x, (10, 12, 40), dtype=jnp.float32)

    y_max = pooling1d(x, "max", 3)                              # no padding path
    y_avg = pooling1d(x, "avg", 3)
    y_max_s2 = pooling1d(x, "max", 3, stride=2, padding=1)      # overlapping + left pad
    y_avg_ceil = pooling1d(x, "avg", 5, ceil_mode=True)         # ragged last window

    # input_dims=4 path (AvgPool2d with a (1, k) kernel == 1-D pooling over axis 1).
    x4 = jax.random.normal(k_x4, (2, 16, 3, 8), dtype=jnp.float32)
    y4 = pooling1d(x4, "avg", 4)                                # (2, 4, 3, 8)

    jax.block_until_ready((y_max, y_avg, y_max_s2, y_avg_ceil, y4))

    xn = np.asarray(x)
    checks = [
        (y_max, _ref_pool(xn, "max", 3), (10, 4, 40)),
        (y_avg, _ref_pool(xn, "avg", 3), (10, 4, 40)),
        (y_max_s2, _ref_pool(xn, "max", 3, stride=2, padding=1), (10, 6, 40)),
        (y_avg_ceil, _ref_pool(xn, "avg", 5, ceil_mode=True), (10, 3, 40)),
        (y4, _ref_pool(np.asarray(x4), "avg", 4), (2, 4, 3, 8)),
    ]
    for got, ref, shp in checks:
        assert got.shape == shp, (got.shape, shp)
        np.testing.assert_allclose(np.asarray(got), ref, rtol=1e-5, atol=1e-5)

    print("KERNEL_OK")
</pallas_src>

<mosaic_0001>
module attributes {stable_mosaic.version = 11 : i64} {
  func.func @_pool1d_kernel(%arg0: i32, %arg1: i32, %arg2: i32, %arg3: memref<10x12x40xf32, #tpu.memory_space<vmem>>, %arg4: memref<10x4x40xf32, #tpu.memory_space<vmem>>) attributes {dimension_semantics = [#tpu.dimension_semantics<parallel>, #tpu.dimension_semantics<parallel>, #tpu.dimension_semantics<parallel>], iteration_bounds = array<i64: 1, 1, 1>, scalar_prefetch = 0 : i64, scratch_operands = 0 : i64, tpu.core_type = #tpu.core_type<tc>, window_params = [{transform_indices = @transform_0, window_bounds = array<i64: 10, 12, 40>}, {transform_indices = @transform_1, window_bounds = array<i64: 10, 4, 40>}]} {
    %c0 = arith.constant 0 : index
    %c0_0 = arith.constant 0 : index
    %c0_1 = arith.constant 0 : index
    %0 = tpu.strided_load %arg3[%c0, %c0_0, %c0_1] {strides = array<i32: 1, 3, 1>} : memref<10x12x40xf32, #tpu.memory_space<vmem>>, vector<10x4x40xf32>
    %c0_2 = arith.constant 0 : index
    %c1 = arith.constant 1 : index
    %c0_3 = arith.constant 0 : index
    %1 = tpu.strided_load %arg3[%c0_2, %c1, %c0_3] {strides = array<i32: 1, 3, 1>} : memref<10x12x40xf32, #tpu.memory_space<vmem>>, vector<10x4x40xf32>
    %2 = arith.maximumf %0, %1 : vector<10x4x40xf32>
    %c0_4 = arith.constant 0 : index
    %c2 = arith.constant 2 : index
    %c0_5 = arith.constant 0 : index
    %3 = tpu.strided_load %arg3[%c0_4, %c2, %c0_5] {strides = array<i32: 1, 3, 1>} : memref<10x12x40xf32, #tpu.memory_space<vmem>>, vector<10x4x40xf32>
    %4 = arith.maximumf %2, %3 : vector<10x4x40xf32>
    %c0_6 = arith.constant 0 : index
    %c0_7 = arith.constant 0 : index
    %c0_8 = arith.constant 0 : index
    %5 = vector.load %arg4[%c0_6, %c0_7, %c0_8] : memref<10x4x40xf32, #tpu.memory_space<vmem>>, vector<10x4x40xf32>
    tpu.vector_store %arg4[%c0_6, %c0_7, %c0_8], %4 {strides = array<i32>} : memref<10x4x40xf32, #tpu.memory_space<vmem>>, vector<10x4x40xf32>,
    return
  }
  func.func @transform_0(%arg0: i32, %arg1: i32, %arg2: i32) -> (i32, i32, i32) {
    %c0_i32 = arith.constant 0 : i32
    return %arg0, %arg1, %arg2 : i32, i32, i32
  }
  func.func @transform_1(%arg0: i32, %arg1: i32, %arg2: i32) -> (i32, i32, i32) {
    %c0_i32 = arith.constant 0 : i32
    return %arg0, %arg1, %arg2 : i32, i32, i32
  }
}

</mosaic_0001>

<bundles_post_ra>
// kernel: tpu_custom_call.1
= control target key start
LH: loop header
LB: loop body
LE: loop exit
PB: predicated region body
PF: predicated region fallthrough
CT: control target
= control target key end

     0   :  { %6 = vsyncpa [#allocation3], 0  ;;  %s237_s0 = inlined_call_operand.hbm [shape: f32[10,12,40], index: 0, kind: input, shape index: {}]   ;;  %s238_s1 = inlined_call_operand.hbm [shape: f32[10,4,40], index: 1, kind: output, shape index: {}]  }
   0x1   :  { %7 = vsyncpa [#allocation4], 0  ;;  %s184_s6 = smov [#allocation2]   ;;  %s136_s10 = scalar_lea.hbm %s237_s0, 2560 }
   0x2   :  { %s13_s7 = sshll.u32 %s184_s6, 4  ;;  %p137_p0 = scmp.ne.s32.totalorder %s237_s0, %s136_s10  ;;  %s14_s7 = int_to_ptr.vmem [resolvable:$true] %s13_s7 }
   0x3   :  { %p140_p1 = scmp.lt.u32.totalorder %s136_s10, %s237_s0 }
   0x5   :  { %p142_p2 = pnand %p140_p1, %p137_p0 }
   0x7   :  { %145 = shalt.err (!%p142_p2)
}
   0x8   :  { %s146_s15 = scalar_lea.vmem %s14_s7, 2560  ;;  %p151_p4 = scmp.lt.s32.totalorder %s14_s7, %s14_s7 }
   0x9   :  { %p147_p3 = scmp.ne.s32.totalorder %s14_s7, %s146_s15  ;;  %p152_p5 = scmp.lt.s32.totalorder %s146_s15, %s146_s15 }
   0xb   :  { %p153_p6 = por %p152_p5, %p151_p4 }
   0xd   :  { %p154_p7 = pnand %p153_p6, %p147_p3 }
   0xf   :  { %157 = shalt.err (!%p154_p7)
}
  0x10   :  { %s185_s16 = smov 128   ;;  %s186_s17 = smov 8  }
  0x11   :  { %19 = dma.hbm_to_vmem [thread:$0]  %s237_s0, 2560, %s14_s7, [#allocation3], %s185_s16, %s185_s16, %s186_s17  }
  0x12   :  { %180 = dma.done.wait [#allocation3], 2560  }
  0x13   :  { %181 = vsyncadd [#allocation3], 4294964736  ;;  %vm102_vm0 = vcmask 322560   ;;  %s187_s20 = smov [#allocation5]  }
  0x14   :  { %s212_s21 = sshll.u32 %s187_s20, 4  ;;  %v23_v0 = vld [vmem:[#allocation2] ss:$3 sm:$0xf]  ;;  %s119_s21 = int_to_ptr.vmem [resolvable:$true] %s212_s21 }
  0x15   :  { %v43_v1 = vld [vmem:[#allocation2 + $0x1] ss:$3 sm:$0xf]  ;;  %v73_v3 = vld [vmem:[#allocation2 + $0x2] ss:$3 sm:$0xf]  ;;  %p163_p9 = scmp.lt.s32.totalorder %s119_s21, %s119_s21 }
  0x16   :  { %v62_v2 = vmax.f32 %v23_v0, %v43_v1  ;;  %v25_v4 = vld [vmem:[#allocation2 + $0x10] ss:$3 sm:$0xf]  ;;  %v45_v5 = vld [vmem:[#allocation2 + $0x11] ss:$3 sm:$0xf] }
  0x17   :  { %v75_v6 = vld [vmem:[#allocation2 + $0x12] ss:$3 sm:$0xf]  ;;  %v63_v8 = vmax.f32 %v25_v4, %v45_v5  ;;  %v27_v9 = vld [vmem:[#allocation2 + $0x20] ss:$3 sm:$0xf] }
  0x18   :  { %v92_v7 = vmax.f32 %v62_v2, %v73_v3  ;;  %v47_v10 = vld [vmem:[#allocation2 + $0x21] ss:$3 sm:$0xf]  ;;  %v77_v12 = vld [vmem:[#allocation2 + $0x22] ss:$3 sm:$0xf] }
  0x19   :  { %v64_v11 = vmax.f32 %v27_v9, %v47_v10  ;;  %v29_v13 = vld [vmem:[#allocation2 + $0x30] ss:$3 sm:$0xf]  ;;  %v93_v14 = vmax.f32 %v63_v8, %v75_v6  ;;  %v49_v15 = vld [vmem:[#allocation2 + $0x31] ss:$3 sm:$0xf] }
  0x1a   :  { %103 = vst.msk [vmem:[#allocation5] sm:$0xf] %vm102_vm0, %v92_v7  ;;  %v79_v16 = vld [vmem:[#allocation2 + $0x32] ss:$3 sm:$0xf]  ;;  %v65_v18 = vmax.f32 %v29_v13, %v49_v15  ;;  %s158_s0 = scalar_lea.vmem %s119_s21, 640 }
  0x1b   :  { %v94_v17 = vmax.f32 %v64_v11, %v77_v12  ;;  %v31_v19 = vld [vmem:[#allocation2 + $0x40] ss:$3 sm:$0xf]  ;;  %v51_v20 = vld [vmem:[#allocation2 + $0x41] ss:$3 sm:$0xf]  ;;  %p159_p8 = scmp.ne.s32.totalorder %s119_s21, %s158_s0  ;;  %p164_p10 = scmp.lt.s32.totalorder %s158_s0, %s158_s0 }
  0x1c   :  { %104 = vst.msk [vmem:[#allocation5 + $0x4] sm:$0xf] %vm102_vm0, %v93_v14  ;;  %v66_v21 = vmax.f32 %v31_v19, %v51_v20  ;;  %v81_v22 = vld [vmem:[#allocation2 + $0x42] ss:$3 sm:$0xf]  ;;  %v95_v24 = vmax.f32 %v65_v18, %v79_v16 }
  0x1d   :  { %v33_v23 = vld [vmem:[#allocation2 + $0x50] ss:$3 sm:$0xf]  ;;  %105 = vst.msk [vmem:[#allocation5 + $0x8] sm:$0xf] %vm102_vm0, %v94_v17  ;;  %p165_p11 = por %p164_p10, %p163_p9 }
  0x1e   :  { %v53_v25 = vld [vmem:[#allocation2 + $0x51] ss:$3 sm:$0xf]  ;;  %v83_v26 = vld [vmem:[#allocation2 + $0x52] ss:$3 sm:$0xf]  ;;  %v96_v27 = vmax.f32 %v66_v21, %v81_v22 }
  0x1f   :  { %v67_v28 = vmax.f32 %v33_v23, %v53_v25  ;;  %v35_v29 = vld [vmem:[#allocation2 + $0x60] ss:$3 sm:$0xf]  ;;  %v55_v30 = vld [vmem:[#allocation2 + $0x61] ss:$3 sm:$0xf]  ;;  %p166_p12 = pnand %p165_p11, %p159_p8 }
  0x20   :  { %106 = vst.msk [vmem:[#allocation5 + $0xc] sm:$0xf] %vm102_vm0, %v95_v24  ;;  %v68_v31 = vmax.f32 %v35_v29, %v55_v30  ;;  %v85_v32 = vld [vmem:[#allocation2 + $0x62] ss:$3 sm:$0xf] }
  0x21   :  { %v37_v33 = vld [vmem:[#allocation2 + $0x70] ss:$3 sm:$0xf]  ;;  %107 = vst.msk [vmem:[#allocation5 + $0x10] sm:$0xf] %vm102_vm0, %v96_v27  ;;  %v97_v34 = vmax.f32 %v67_v28, %v83_v26 }
  0x22   :  { %v57_v35 = vld [vmem:[#allocation2 + $0x71] ss:$3 sm:$0xf]  ;;  %v87_v36 = vld [vmem:[#allocation2 + $0x72] ss:$3 sm:$0xf]  ;;  %v98_v37 = vmax.f32 %v68_v31, %v85_v32 }
  0x23   :  { %v69_v38 = vmax.f32 %v37_v33, %v57_v35  ;;  %v39_v39 = vld [vmem:[#allocation2 + $0x80] ss:$3 sm:$0xf]  ;;  %v59_v40 = vld [vmem:[#allocation2 + $0x81] ss:$3 sm:$0xf] }
  0x24   :  { %108 = vst.msk [vmem:[#allocation5 + $0x14] sm:$0xf] %vm102_vm0, %v97_v34  ;;  %v70_v41 = vmax.f32 %v39_v39, %v59_v40  ;;  %v89_v42 = vld [vmem:[#allocation2 + $0x82] ss:$3 sm:$0xf] }
  0x25   :  { %v41_v43 = vld [vmem:[#allocation2 + $0x90] ss:$3 sm:$0xf]  ;;  %109 = vst.msk [vmem:[#allocation5 + $0x18] sm:$0xf] %vm102_vm0, %v98_v37  ;;  %v99_v44 = vmax.f32 %v69_v38, %v87_v36 }
  0x26   :  { %v61_v45 = vld [vmem:[#allocation2 + $0x91] ss:$3 sm:$0xf]  ;;  %v91_v46 = vld [vmem:[#allocation2 + $0x92] ss:$3 sm:$0xf]  ;;  %v100_v47 = vmax.f32 %v70_v41, %v89_v42 }
  0x27   :  { %v71_v48 = vmax.f32 %v41_v43, %v61_v45  ;;  %110 = vst.msk [vmem:[#allocation5 + $0x1c] sm:$0xf] %vm102_vm0, %v99_v44 }
  0x28   :  { %111 = vst.msk [vmem:[#allocation5 + $0x20] sm:$0xf] %vm102_vm0, %v100_v47 }
  0x29   :  { %v101_v49 = vmax.f32 %v71_v48, %v91_v46 }
  0x2b   :  { %112 = vst.msk [vmem:[#allocation5 + $0x24] sm:$0xf] %vm102_vm0, %v101_v49 }
  0x2c   :  { %169 = shalt.err (!%p166_p12)
}
  0x2d   :  { %s170_s24 = scalar_lea.hbm %s238_s1, 640 }
  0x2e   :  { %p171_p13 = scmp.ne.s32.totalorder %s238_s1, %s170_s24  ;;  %p174_p0 = scmp.lt.u32.totalorder %s170_s24, %s238_s1 }
  0x30   :  { %p176_p1 = pnand %p174_p0, %p171_p13 }
  0x32   :  { %179 = shalt.err (!%p176_p1)
}
  0x33   :  { %s188_s29 = smov 64   ;;  %s189_s30 = smov 4  }
  0x34   :  { %124 = dma.vmem_to_hbm [thread:$0]  %s119_s21, 640, %s238_s1, [#allocation4], %s188_s29, %s188_s29, %s189_s30  }
  0x35   :  { %182 = dma.done.wait [#allocation4], 640  }
  0x36   :  { %183 = vsyncadd [#allocation4], 4294966656 }
  0x37   :  { %128 = vsyncpa [#allocation3], 1 }
  0x38   :  { %129 = vsyncpa [#allocation4], 1 }

</bundles_post_ra>
